<compile_context>
chip_gen: v7x
topology: tpu7x:2x2x1
jax: 0.10.0
libtpu: 0.0.40
codegen_flags: <defaults>
</compile_context>

<pallas_src>
import math

import jax
import jax.numpy as jnp
from jax.experimental import pallas as pl
from jax.experimental.pallas import tpu as pltpu


def _cdiv(a, b):
    return -(-a // b)


def _round_up(a, b):
    return _cdiv(a, b) * b


# -------------------------------------------------------------------------
# ada_hermite: Hermite function system Phi(params). Parameter-only glue (JAX).
# -------------------------------------------------------------------------
def ada_hermite_phi(n_in, n_out, params, dtype=jnp.float32):
    dilation = params[0]
    translation = params[1]
    # TODO(synk): original ada_hermite assumes dilation > 0 (init=[0.1, 0.0]);
    # no clamp is applied here to preserve parity with the PyTorch builder.
    t = dilation * (jnp.arange(n_in, dtype=dtype) - (n_in - 1) / 2.0 - translation)
    h = [jnp.asarray(math.pi ** (-0.25), dtype) * jnp.exp(-0.5 * t * t)]
    if n_out > 1:
        h.append(jnp.sqrt(jnp.asarray(2.0, dtype)) * t * h[0])
    for k in range(2, n_out):
        h.append(jnp.sqrt(2.0 / k) * t * h[k - 1] - jnp.sqrt((k - 1) / k) * h[k - 2])
    phi = jnp.stack(h[:n_out], axis=1) * jnp.sqrt(dilation)  # (n_in, n_out)
    return phi.astype(dtype)


# -------------------------------------------------------------------------
# Weight precomputation: depends only on the 2-element params -> cache/reuse
# across forward calls instead of recomputing (SVD pinv) per batch.
# -------------------------------------------------------------------------
def precompute_tdvp_weights(params, n_in, n_out, td, dtype=jnp.float32):
    phi = ada_hermite_phi(n_in, n_out, params, dtype=dtype)   # (n_in, n_out)
    # pinv (SVD) kept for exact parity with torch.linalg.pinv; it is a one-time
    # parameter-only cost here.  (A normal-equations solve would be faster but
    # less robust when phi is ill-conditioned, e.g. at small dilation.)
    phip = jnp.linalg.pinv(phi)                               # (n_out, n_in)
    w = phip.T                                                # (n_in, n_out)
    # Fuse the trailing td-repeat: columns [w0]*td, [w1]*td, ... so the flat
    # output row-major-views to (n_out, td) exactly like .unsqueeze(-1).repeat.
    w_rep = jnp.repeat(w, td, axis=1)                         # (n_in, n_out*td)

    # Lane folding: fold F consecutive batch rows into the lane dimension via a
    # block-diagonal weight.  Only applied when n_in divides 128.
    fold = 128 // n_in if (n_in <= 128 and 128 % n_in == 0) else 1
    if fold > 1:
        w_rep = jnp.kron(jnp.eye(fold, dtype=dtype), w_rep)   # (F*n_in, F*nt)
    return w_rep, fold


# -------------------------------------------------------------------------
# Pallas kernel: one lane-dense GEMM per batch tile.
#   x_ref: (tm, F*n_in)   w_ref: (F*n_in, F*nt)   o_ref: (tm, F*nt)
# -------------------------------------------------------------------------
def tdvp_kernel(x_ref, w_ref, o_ref):
    o_ref[...] = jnp.dot(
        x_ref[...], w_ref[...], preferred_element_type=jnp.float32
    ).astype(o_ref.dtype)


def tdvp_apply(x, w_big, fold, n_out, td):
    """x: (N, C, n_in) float32; w_big: (fold*n_in, fold*n_out*td) precomputed."""
    N, C, L = x.shape
    nt = n_out * td
    lane_in = fold * L
    lane_out = fold * nt
    itemsize = jnp.dtype(x.dtype).itemsize

    M = N * C
    Mf = _cdiv(M, fold)                       # folded row count

    # Batch tile (in folded rows): target ~3 MiB of HBM traffic per grid step,
    # multiple of 8 sublanes.  Keep >= 2 grid steps when there is enough work
    # (v7x megacore) and avoid over-padding small batches.
    row_bytes = (lane_in + lane_out) * itemsize
    tm = max(8, min((3 << 20) // max(row_bytes, 1), 8192))
    tm = max(8, (tm // 8) * 8)
    if Mf <= 8:
        tm = 8
    else:
        tm = min(tm, _round_up(_cdiv(Mf, 2), 8))

    Mf_p = _round_up(Mf, tm)
    grid = Mf_p // tm

    # Pad the flattened batch once, then take the free row-major lane-fold view.
    x2d = x.reshape(M, L)
    pad_rows = Mf_p * fold - M
    if pad_rows:
        x2d = jnp.pad(x2d, ((0, pad_rows), (0, 0)))
    x_folded = x2d.reshape(Mf_p, lane_in)

    # VMEM budget: double-buffered x/out tiles + (double-buffered) resident
    # weight tile.  Cap the request at 48 MiB so it is valid on v7x (64 MiB/TC).
    vmem_needed = (2 * tm * (lane_in + lane_out) + 2 * lane_in * lane_out) * itemsize
    vmem_limit = int(min(max(2 * vmem_needed, 4 << 20), 48 << 20))

    out_folded = pl.pallas_call(
        tdvp_kernel,
        out_shape=jax.ShapeDtypeStruct((Mf_p, lane_out), x.dtype),
        grid=(grid,),
        in_specs=[
            pl.BlockSpec((tm, lane_in), lambda i: (i, 0)),
            pl.BlockSpec((lane_in, lane_out), lambda i: (0, 0)),  # resident weight
        ],
        out_specs=pl.BlockSpec((tm, lane_out), lambda i: (i, 0)),
        compiler_params=pltpu.CompilerParams(
            dimension_semantics=("parallel",),
            vmem_limit_bytes=vmem_limit,
        ),
    )(x_folded, w_big)

    # Free row-major views back to the PyTorch output layout.
    out2d = out_folded.reshape(Mf_p * fold, nt)[:M]
    return out2d.reshape(N, C, n_out, td)


def tdvp_forward(x, weight, n_in, n_out, td):
    """One-shot convenience wrapper (recomputes the parameter-only weights)."""
    del n_in  # implied by x.shape[-1]
    w_big, fold = precompute_tdvp_weights(weight, x.shape[-1], n_out, td, dtype=x.dtype)
    return tdvp_apply(x, w_big, fold, n_out, td)


# -------------------------------------------------------------------------
# Pure-JAX reference of the PyTorch forward (for correctness check)
# -------------------------------------------------------------------------
def tdvp_reference(x, weight, n_in, n_out, td):
    phi = ada_hermite_phi(n_in, n_out, weight, dtype=x.dtype)
    phip = jnp.linalg.pinv(phi)
    coeffs = jnp.einsum("jl,ncl->ncj", phip, x,
                        precision=jax.lax.Precision.HIGHEST)      # (N, C, n_out)
    return jnp.broadcast_to(coeffs[..., None], coeffs.shape + (td,))


def _assert_close(out, ref, name, rtol=1e-3):
    # pinv(phi) is ill-conditioned at dilation=0.1 -> coefficients are large,
    # so use a magnitude-scaled max-norm tolerance (robust to summation order).
    scale = float(jnp.maximum(jnp.max(jnp.abs(ref)), 1.0))
    err = float(jnp.max(jnp.abs(out - ref)))
    assert err <= rtol * scale, f"{name}: max|err|={err:.3e} scale={scale:.3e}"


if __name__ == "__main__":
    # Small, deterministic shapes consistent with the module: x (N, C, L=n_in).
    N, C = 2, 4
    n_in, n_out, td = 16, 8, 4

    key = jax.random.PRNGKey(0)
    x = jax.random.normal(key, (N, C, n_in), dtype=jnp.float32)
    weight = jnp.array([0.1, 0.0], dtype=jnp.float32)   # module default init

    # Parameter-only weights: precompute once, reuse across forward calls.
    w_big, fold = precompute_tdvp_weights(weight, n_in, n_out, td)

    out = jax.block_until_ready(tdvp_apply(x, w_big, fold, n_out, td))
    ref = tdvp_reference(x, weight, n_in, n_out, td)
    assert out.shape == (N, C, n_out, td), out.shape
    _assert_close(out, ref, "base")

    # Non-divisible, larger batch: exercises the padded / lane-folded grid path.
    N2, C2 = 3, 7
    x2 = jax.random.normal(jax.random.PRNGKey(1), (N2, C2, n_in), dtype=jnp.float32)
    out2 = jax.block_until_ready(tdvp_apply(x2, w_big, fold, n_out, td))
    ref2 = tdvp_reference(x2, weight, n_in, n_out, td)
    assert out2.shape == (N2, C2, n_out, td), out2.shape
    _assert_close(out2, ref2, "padded")

    print("KERNEL_OK")
</pallas_src>

<mosaic_0001>
module attributes {stable_mosaic.version = 11 : i64} {
  func.func @tdvp_kernel(%arg0: i32, %arg1: memref<8x128xf32, #tpu.memory_space<vmem>>, %arg2: memref<128x256xf32, #tpu.memory_space<vmem>>, %arg3: memref<8x256xf32, #tpu.memory_space<vmem>>) attributes {dimension_semantics = [#tpu.dimension_semantics<parallel>], iteration_bounds = array<i64: 1>, scalar_prefetch = 0 : i64, scratch_operands = 0 : i64, tpu.core_type = #tpu.core_type<tc>, window_params = [{transform_indices = @transform_0, window_bounds = array<i64: 8, 128>}, {pipeline_mode = #tpu.pipeline_mode<synchronous>, transform_indices = @transform_1, window_bounds = array<i64: 128, 256>}, {transform_indices = @transform_2, window_bounds = array<i64: 8, 256>}]} {
    %c0 = arith.constant 0 : index
    %c0_0 = arith.constant 0 : index
    %0 = vector.load %arg1[%c0, %c0_0] : memref<8x128xf32, #tpu.memory_space<vmem>>, vector<8x128xf32>
    %c0_1 = arith.constant 0 : index
    %c0_2 = arith.constant 0 : index
    %1 = vector.load %arg2[%c0_1, %c0_2] : memref<128x256xf32, #tpu.memory_space<vmem>>, vector<128x256xf32>
    %cst = arith.constant dense<0.000000e+00> : vector<8x256xf32>
    %2 = tpu.matmul %0, %1, %cst {dimension_numbers = #tpu.dot_dimension_numbers<[1], [0], [0], [1], [0, 0, 1, 1], [], []>} : vector<8x128xf32>, vector<128x256xf32>, vector<8x256xf32> -> vector<8x256xf32>
    %c0_3 = arith.constant 0 : index
    %c0_4 = arith.constant 0 : index
    %3 = vector.load %arg3[%c0_3, %c0_4] : memref<8x256xf32, #tpu.memory_space<vmem>>, vector<8x256xf32>
    tpu.vector_store %arg3[%c0_3, %c0_4], %2 {strides = array<i32>} : memref<8x256xf32, #tpu.memory_space<vmem>>, vector<8x256xf32>,
    return
  }
  func.func @transform_0(%arg0: i32) -> (i32, i32) {
    %c0_i32 = arith.constant 0 : i32
    %c0_i32_0 = arith.constant 0 : i32
    return %arg0, %c0_i32 : i32, i32
  }
  func.func @transform_1(%arg0: i32) -> (i32, i32) {
    %c0_i32 = arith.constant 0 : i32
    %c0_i32_0 = arith.constant 0 : i32
    %c0_i32_1 = arith.constant 0 : i32
    return %c0_i32, %c0_i32_0 : i32, i32
  }
  func.func @transform_2(%arg0: i32) -> (i32, i32) {
    %c0_i32 = arith.constant 0 : i32
    %c0_i32_0 = arith.constant 0 : i32
    return %arg0, %c0_i32 : i32, i32
  }
}

</mosaic_0001>

<bundles_post_ra>
// kernel: tpu_custom_call.1
= control target key start
LH: loop header
LB: loop body
LE: loop exit
PB: predicated region body
PF: predicated region fallthrough
CT: control target
= control target key end

     0   :  { %7 = vsyncpa [#allocation3], 0  ;;  %s334_s0 = inlined_call_operand.hbm [shape: f32[8,128], index: 0, kind: input, shape index: {}]   ;;  %s335_s1 = inlined_call_operand.hbm [shape: f32[128,256], index: 1, kind: input, shape index: {}]   ;;  %s336_s2 = inlined_call_operand.hbm [shape: f32[8,256], index: 2, kind: output, shape index: {}]  }
   0x1   :  { %8 = vsyncpa [#allocation6], 0 }
   0x2   :  { %9 = vsyncpa [#allocation4], 0  ;;  %s270_s9 = smov [#allocation2]   ;;  %s271_s11 = smov [#allocation5]  }
   0x3   :  { %s16_s10 = sshll.u32 %s270_s9, 4  ;;  %s25_s12 = sshll.u32 %s271_s11, 4  ;;  %s17_s10 = int_to_ptr.vmem [resolvable:$true] %s16_s10  ;;  %s291_s12 = int_to_ptr.vmem [resolvable:$true] %s25_s12 }
   0x4   :  { %s198_s15 = scalar_lea.hbm %s334_s0, 128 }
   0x5   :  { %p199_p0 = scmp.ne.s32.totalorder %s334_s0, %s198_s15  ;;  %p202_p1 = scmp.lt.u32.totalorder %s198_s15, %s334_s0 }
   0x7   :  { %p204_p2 = pnand %p202_p1, %p199_p0 }
   0x9   :  { %207 = shalt.err (!%p204_p2)
}
   0xa   :  { %s208_s20 = scalar_lea.vmem %s17_s10, 128  ;;  %p213_p4 = scmp.lt.s32.totalorder %s17_s10, %s17_s10 }
   0xb   :  { %p209_p3 = scmp.ne.s32.totalorder %s17_s10, %s208_s20  ;;  %p214_p5 = scmp.lt.s32.totalorder %s208_s20, %s208_s20 }
   0xd   :  { %p215_p6 = por %p214_p5, %p213_p4 }
   0xf   :  { %p216_p7 = pnand %p215_p6, %p209_p3 }
  0x11   :  { %219 = shalt.err (!%p216_p7)
}
  0x12   :  { %19 = dma.hbm_to_vmem [thread:$0]  %s334_s0, 128, %s17_s10, [#allocation3]  }
  0x13   :  { %s220_s25 = scalar_lea.hbm %s335_s1, 4096 }
  0x14   :  { %p221_p8 = scmp.ne.s32.totalorder %s335_s1, %s220_s25  ;;  %p224_p9 = scmp.lt.u32.totalorder %s220_s25, %s335_s1 }
  0x16   :  { %p226_p10 = pnand %p224_p9, %p221_p8 }
  0x18   :  { %229 = shalt.err (!%p226_p10)
}
  0x19   :  { %s230_s30 = scalar_lea.vmem %s291_s12, 4096  ;;  %p235_p12 = scmp.lt.s32.totalorder %s291_s12, %s291_s12 }
  0x1a   :  { %p231_p11 = scmp.ne.s32.totalorder %s291_s12, %s230_s30  ;;  %p236_p13 = scmp.lt.s32.totalorder %s230_s30, %s230_s30 }
  0x1c   :  { %p237_p0 = por %p236_p13, %p235_p12 }
  0x1e   :  { %p238_p1 = pnand %p237_p0, %p231_p11 }
  0x20   :  { %241 = shalt.err (!%p238_p1)
}
  0x21   :  { %s272_s0 = smov 256   ;;  %s273_s3 = smov 16  }
  0x22   :  { %31 = dma.hbm_to_vmem [thread:$0]  %s335_s1, 4096, %s291_s12, [#allocation6], %s272_s0, %s272_s0, %s273_s3  }
  0x23   :  { %264 = dma.done.wait [#allocation3], 128  }
  0x24   :  { %265 = vsyncadd [#allocation3], 4294967168 }
  0x25   :  { %266 = dma.done.wait [#allocation6], 4096  }
  0x26   :  { %267 = vsyncadd [#allocation6], 4294963200  ;;  %v274_v0 = vmov 0.0   ;;  %v40_v1 = vld [vmem:[#allocation5 + $0x8] sm:$0xff]  ;;  %v42_v2 = vld [vmem:[#allocation5 + $0x18] sm:$0xff]  ;;  %s275_s1 = smov [#allocation7]  }
  0x27   :  { %135 = vmatprep.mubr.f32.mxu0 %v274_v0  ;;  %v39_v3 = vld [vmem:[#allocation5] sm:$0xff]  ;;  %v160_v4 = vpack.c.bf16 %v42_v2, %v40_v1  ;;  %v41_v5 = vld [vmem:[#allocation5 + $0x10] sm:$0xff]  ;;  %v44_v6 = vld [vmem:[#allocation5 + $0x28] sm:$0xff]  ;;  %s150_s6 = sshll.u32 %s275_s1, 4  ;;  %s151_s6 = int_to_ptr.vmem [resolvable:$true] %s150_s6 }
  0x28   :  { %v46_v7 = vld [vmem:[#allocation5 + $0x38] sm:$0xff]  ;;  %v162_v8 = vpack.c.bf16 %v41_v5, %v39_v3  ;;  %v43_v10 = vld [vmem:[#allocation5 + $0x20] sm:$0xff]  ;;  %v45_v11 = vld [vmem:[#allocation5 + $0x30] sm:$0xff]  ;;  %s242_s7 = scalar_lea.vmem %s151_s6, 256  ;;  %p247_p3 = scmp.lt.s32.totalorder %s151_s6, %s151_s6 }
  0x29   :  { %v164_v9 = vpack.c.bf16 %v46_v7, %v44_v6  ;;  %v48_v12 = vld [vmem:[#allocation5 + $0x48] sm:$0xff]  ;;  %161 = vmatprep.subr.bf16.mxu0 %v160_v4  ;;  %v50_v13 = vld [vmem:[#allocation5 + $0x58] sm:$0xff]  ;;  %v166_v14 = vpack.c.bf16 %v45_v11, %v43_v10  ;;  %v47_v16 = vld [vmem:[#allocation5 + $0x40] sm:$0xff]  ;;  %p243_p2 = scmp.ne.s32.totalorder %s151_s6, %s242_s7  ;;  %p248_p4 = scmp.lt.s32.totalorder %s242_s7, %s242_s7 }
  0x2a   :  { %163 = vmatpush1.bf16.msra.mxu0 %v162_v8  ;;  %v168_v15 = vpack.c.bf16 %v50_v13, %v48_v12  ;;  %v49_v17 = vld [vmem:[#allocation5 + $0x50] sm:$0xff]  ;;  %v52_v18 = vld [vmem:[#allocation5 + $0x68] sm:$0xff]  ;;  %v54_v19 = vld [vmem:[#allocation5 + $0x78] sm:$0xff] }
  0x2b   :  { %165 = vmatprep.subr.bf16.mxu0 %v164_v9  ;;  %v170_v20 = vpack.c.bf16 %v49_v17, %v47_v16  ;;  %v172_v21 = vpack.c.bf16 %v54_v19, %v52_v18  ;;  %v51_v22 = vld [vmem:[#allocation5 + $0x60] sm:$0xff]  ;;  %v53_v23 = vld [vmem:[#allocation5 + $0x70] sm:$0xff]  ;;  %v56_v24 = vld [vmem:[#allocation5 + $0x88] sm:$0xff]  ;;  %p249_p5 = por %p248_p4, %p247_p3 }
  0x2c   :  { %v58_v25 = vld [vmem:[#allocation5 + $0x98] sm:$0xff]  ;;  %v174_v26 = vpack.c.bf16 %v53_v23, %v51_v22  ;;  %v55_v28 = vld [vmem:[#allocation5 + $0x80] sm:$0xff]  ;;  %v57_v29 = vld [vmem:[#allocation5 + $0x90] sm:$0xff] }
  0x2d   :  { %v176_v27 = vpack.c.bf16 %v58_v25, %v56_v24  ;;  %v60_v30 = vld [vmem:[#allocation5 + $0xa8] sm:$0xff]  ;;  %v62_v31 = vld [vmem:[#allocation5 + $0xb8] sm:$0xff]  ;;  %v178_v32 = vpack.c.bf16 %v57_v29, %v55_v28  ;;  %v59_v34 = vld [vmem:[#allocation5 + $0xa0] sm:$0xff]  ;;  %p250_p6 = pnand %p249_p5, %p243_p2 }
  0x2e   :  { %167 = vmatpush1.bf16.msra.mxu0 %v166_v14  ;;  %v180_v33 = vpack.c.bf16 %v62_v31, %v60_v30  ;;  %v61_v35 = vld [vmem:[#allocation5 + $0xb0] sm:$0xff]  ;;  %v64_v36 = vld [vmem:[#allocation5 + $0xc8] sm:$0xff]  ;;  %v66_v37 = vld [vmem:[#allocation5 + $0xd8] sm:$0xff] }
  0x2f   :  { %169 = vmatprep.subr.bf16.mxu0 %v168_v15  ;;  %v182_v38 = vpack.c.bf16 %v61_v35, %v59_v34  ;;  %v184_v39 = vpack.c.bf16 %v66_v37, %v64_v36  ;;  %v63_v40 = vld [vmem:[#allocation5 + $0xc0] sm:$0xff]  ;;  %v65_v41 = vld [vmem:[#allocation5 + $0xd0] sm:$0xff]  ;;  %v68_v42 = vld [vmem:[#allocation5 + $0xe8] sm:$0xff] }
  0x30   :  { %v70_v43 = vld [vmem:[#allocation5 + $0xf8] sm:$0xff]  ;;  %v186_v44 = vpack.c.bf16 %v65_v41, %v63_v40  ;;  %v67_v46 = vld [vmem:[#allocation5 + $0xe0] sm:$0xff]  ;;  %v69_v47 = vld [vmem:[#allocation5 + $0xf0] sm:$0xff] }
  0x31   :  { %v188_v45 = vpack.c.bf16 %v70_v43, %v68_v42  ;;  %v190_v48 = vpack.c.bf16 %v69_v47, %v67_v46  ;;  %v38_v49 = vld [vmem:[#allocation2] sm:$0xff] }
  0x32   :  { %171 = vmatpush1.bf16.msra.mxu0 %v170_v20 }
  0x33   :  { %173 = vmatprep.subr.bf16.mxu0 %v172_v21 }
  0x36   :  { %175 = vmatpush1.bf16.msra.mxu0 %v174_v26 }
  0x37   :  { %177 = vmatprep.subr.bf16.mxu0 %v176_v27 }
  0x3a   :  { %179 = vmatpush1.bf16.msra.mxu0 %v178_v32 }
  0x3b   :  { %181 = vmatprep.subr.bf16.mxu0 %v180_v33 }
  0x3e   :  { %183 = vmatpush1.bf16.msra.mxu0 %v182_v38 }
  0x3f   :  { %185 = vmatprep.subr.bf16.mxu0 %v184_v39 }
  0x42   :  { %187 = vmatpush1.bf16.msra.mxu0 %v186_v44 }
  0x43   :  { %189 = vmatprep.subr.bf16.mxu0 %v188_v45 }
  0x46   :  { %191 = vmatpush1.bf16.msra.mxu0 %v190_v48 }
  0x49   :  { %136 = vmatmul.mubr.f32.vlgmr.msra.gmra.mrb[0].mxu0 %v38_v49 }
 0x11c   :  { %v137_v50 = vpop.f32.mrb[0].mxu0 }
 0x11d   :  { %142 = vst [vmem:[#allocation7] sm:$0xff] %v137_v50  ;;  %v139_v51 = vpop.f32.mrb[1].mxu0 }
 0x11e   :  { %143 = vst [vmem:[#allocation7 + $0x8] sm:$0xff] %v139_v51 }
 0x11f   :  { %253 = shalt.err (!%p250_p6)
}
 0x120   :  { %s254_s10 = scalar_lea.hbm %s336_s2, 256 }
 0x121   :  { %p255_p7 = scmp.ne.s32.totalorder %s336_s2, %s254_s10  ;;  %p258_p8 = scmp.lt.u32.totalorder %s254_s10, %s336_s2 }
 0x123   :  { %p260_p9 = pnand %p258_p8, %p255_p7 }
 0x125   :  { %263 = shalt.err (!%p260_p9)
}
 0x126   :  { %153 = dma.vmem_to_hbm [thread:$0]  %s151_s6, 256, %s336_s2, [#allocation4]  }
 0x127   :  { %268 = dma.done.wait [#allocation4], 256  }
 0x128   :  { %269 = vsyncadd [#allocation4], 4294967040 }
 0x129   :  { %157 = vsyncpa [#allocation3], 1 }
 0x12a   :  { %158 = vsyncpa [#allocation6], 1 }
 0x12b   :  { %159 = vsyncpa [#allocation4], 1 }

</bundles_post_ra>
